<compile_context>
chip_gen: v7x
topology: tpu7x:2x2x1
jax: 0.10.0
libtpu: 0.0.40
codegen_flags: <defaults>
</compile_context>

<pallas_src>
import functools

import jax
import jax.numpy as jnp
from jax.experimental import pallas as pl
from jax.experimental.pallas import tpu as pltpu


def _round_up(x, m):
    return ((x + m - 1) // m) * m


# ---------------------------------------------------------------------------
# Stage 1 (one-time per call): mix basis matrices into a lane-concatenated
# weight slab   k_cat[:, c*F:(c+1)*F] = sum_b coeffs[b, c] * bases[b, c]
# ---------------------------------------------------------------------------
def _mix_bases_kernel(coeffs_ref, bases_ref, kcat_ref, *, n_bases):
    """coeffs_ref: SMEM [B, C] (scalar prefetch); bases_ref: VMEM [B, 1, F, F];
    kcat_ref: VMEM [F, F] block of the [F, C*F] slab for class c = program_id(0)."""
    c = pl.program_id(0)
    acc = coeffs_ref[0, c] * bases_ref[0, 0]            # f32 mixing (v5e has no bf16 VPU)
    for b in range(1, n_bases):
        acc = acc + coeffs_ref[b, c] * bases_ref[b, 0]
    kcat_ref[...] = acc.astype(kcat_ref.dtype)          # single cast to compute dtype


def _mix_bases(coeffs2d, bases, compute_dtype):
    n_bases, n_classes, in_feats, _ = bases.shape
    kernel = functools.partial(_mix_bases_kernel, n_bases=n_bases)
    return pl.pallas_call(
        kernel,
        out_shape=jax.ShapeDtypeStruct((in_feats, n_classes * in_feats), compute_dtype),
        grid_spec=pltpu.PrefetchScalarGridSpec(
            num_scalar_prefetch=1,                       # coeffs -> SMEM scalars
            grid=(n_classes,),
            in_specs=[
                pl.BlockSpec((n_bases, 1, in_feats, in_feats),
                             lambda c, coeffs: (0, c, 0, 0)),
            ],
            out_specs=pl.BlockSpec((in_feats, in_feats), lambda c, coeffs: (0, c)),
        ),
        compiler_params=pltpu.CompilerParams(
            dimension_semantics=("parallel",)),
    )(coeffs2d, bases)


# ---------------------------------------------------------------------------
# Stage 2: per-row prediction, tiled over N with the weight slab resident.
# ---------------------------------------------------------------------------
def _predict_kernel(u_ref, i_ref, kcat_ref, o_ref, *, n_classes, in_feats):
    """u_ref/i_ref: VMEM [TN, F] f32; kcat_ref: VMEM [F, C*F] bf16 (resident);
    o_ref: VMEM [TN, C] f32."""
    # One wide MXU matmul for all classes: bf16 inputs, f32 accumulation.
    x = i_ref[...].astype(kcat_ref.dtype)                               # [TN, F]
    t = jnp.dot(x, kcat_ref[...], preferred_element_type=jnp.float32)   # [TN, C*F]

    # out[n, c] = sum_g u[n, g] * t[n, c*F + g]
    # Static lane-aligned slices of t + VPU multiply + XLU row reduce; no
    # u_rep / selector-matmul intermediates.
    u = u_ref[...].astype(jnp.float32)                                  # [TN, F]
    cols = []
    for c in range(n_classes):
        t_c = t[:, c * in_feats:(c + 1) * in_feats]                     # [TN, F]
        cols.append(jnp.sum(t_c * u, axis=1, keepdims=True))            # [TN, 1]
    o_ref[...] = jnp.concatenate(cols, axis=1).astype(o_ref.dtype)      # [TN, C]


def rating_predictor_forward(coeffs, bases, u, i, *, tile_n=256,
                             compute_dtype=jnp.bfloat16):
    """coeffs: [B, C, 1, 1], bases: [B, C, F, F], u/i: [N, F]  ->  [N, C] f32.

    tile_n: rows per grid step (256+ saturates the 256-wide MXU on v6e/v7x;
    use 128 on v5e). compute_dtype: MXU input dtype (f32 accumulation always).
    """
    n_bases, n_classes, in_feats, _ = bases.shape
    n_rows = u.shape[0]
    coeffs2d = coeffs.reshape(n_bases, n_classes).astype(jnp.float32)

    # Stage 1: mixed weight slab [F, C*F] in compute_dtype.
    k_cat = _mix_bases(coeffs2d, bases, compute_dtype)

    # Stage 2: grid over N.
    tn = min(tile_n, _round_up(n_rows, 8))
    grid_n = pl.cdiv(n_rows, tn)
    kernel = functools.partial(_predict_kernel,
                               n_classes=n_classes, in_feats=in_feats)

    # VMEM budget: resident k_cat (+spare buffer) + double-buffered u/i/out tiles.
    vmem_needed = (2 * k_cat.size * k_cat.dtype.itemsize
                   + 2 * 2 * tn * in_feats * 4
                   + 2 * tn * n_classes * 4)
    vmem_limit = int(min(64 * 1024 * 1024,
                         max(16 * 1024 * 1024, 2 * vmem_needed)))

    return pl.pallas_call(
        kernel,
        out_shape=jax.ShapeDtypeStruct((n_rows, n_classes), jnp.float32),
        grid_spec=pltpu.PrefetchScalarGridSpec(
            num_scalar_prefetch=0,
            grid=(grid_n,),
            in_specs=[
                pl.BlockSpec((tn, in_feats), lambda n: (n, 0)),                  # u
                pl.BlockSpec((tn, in_feats), lambda n: (n, 0)),                  # i
                pl.BlockSpec((in_feats, n_classes * in_feats), lambda n: (0, 0)),  # k_cat resident
            ],
            out_specs=pl.BlockSpec((tn, n_classes), lambda n: (n, 0)),
        ),
        compiler_params=pltpu.CompilerParams(
            dimension_semantics=("parallel",),
            vmem_limit_bytes=vmem_limit,
        ),
    )(u, i, k_cat)


# ---------------------------------------------------------------------------
# Deterministic synthetic setup + correctness check
# ---------------------------------------------------------------------------
if __name__ == "__main__":
    n_pairs = 16        # N
    in_feats = 128      # F (lane/MXU-granule aligned)
    n_bases = 3         # B
    n_classes = 5       # C

    key = jax.random.PRNGKey(0)
    k1, k2, k3, k4 = jax.random.split(key, 4)
    coeffs = 0.001 * jax.random.normal(k1, (n_bases, n_classes, 1, 1), jnp.float32)
    bases = 0.001 * jax.random.normal(
        k2, (n_bases, n_classes, in_feats, in_feats), jnp.float32)
    u_feat = jax.random.normal(k3, (n_pairs, in_feats), jnp.float32)
    i_feat = jax.random.normal(k4, (n_pairs, in_feats), jnp.float32)

    out = jax.jit(rating_predictor_forward)(coeffs, bases, u_feat, i_feat)
    out = jax.block_until_ready(out)
    assert out.shape == (n_pairs, n_classes)

    # Pure-JAX reference (mirrors the PyTorch forward exactly, full f32).
    kernels = jnp.sum(coeffs * bases, axis=0)                          # [C, F, F]
    ref = jnp.einsum("nf,cfg,ng->nc", i_feat, kernels, u_feat,
                     precision="highest")                              # [N, C]

    # (a) Tight check vs. a reference that applies the same bf16 quantization
    #     of the matmul operands (isolates kernel structure from bf16 rounding).
    kernels_q = kernels.astype(jnp.bfloat16).astype(jnp.float32)
    i_q = i_feat.astype(jnp.bfloat16).astype(jnp.float32)
    ref_q = jnp.einsum("nf,cfg,ng->nc", i_q, kernels_q, u_feat,
                       precision="highest")
    err_q = float(jnp.max(jnp.abs(out - ref_q)))
    assert jnp.allclose(out, ref_q, atol=1e-5, rtol=1e-2), err_q

    # (b) Looser sanity check vs. the exact f32 reference (bf16 MXU inputs,
    #     f32 accumulation; tolerance loosened as flagged in the review).
    err = float(jnp.max(jnp.abs(out - ref)))
    assert jnp.allclose(out, ref, atol=5e-6, rtol=3e-2), err

    print("KERNEL_OK")
</pallas_src>

<mosaic_0001>
module attributes {stable_mosaic.version = 11 : i64} {
  func.func @_predict_kernel(%arg0: i32, %arg1: memref<16x128xf32, #tpu.memory_space<vmem>>, %arg2: memref<16x128xf32, #tpu.memory_space<vmem>>, %arg3: memref<128x640xbf16, #tpu.memory_space<vmem>>, %arg4: memref<16x5xf32, #tpu.memory_space<vmem>>) attributes {dimension_semantics = [#tpu.dimension_semantics<parallel>], iteration_bounds = array<i64: 1>, scalar_prefetch = 0 : i64, scratch_operands = 0 : i64, tpu.core_type = #tpu.core_type<tc>, window_params = [{transform_indices = @transform_0, window_bounds = array<i64: 16, 128>}, {transform_indices = @transform_1, window_bounds = array<i64: 16, 128>}, {pipeline_mode = #tpu.pipeline_mode<synchronous>, transform_indices = @transform_2, window_bounds = array<i64: 128, 640>}, {transform_indices = @transform_3, window_bounds = array<i64: 16, 5>}]} {
    %c0 = arith.constant 0 : index
    %c0_0 = arith.constant 0 : index
    %0 = vector.load %arg2[%c0, %c0_0] : memref<16x128xf32, #tpu.memory_space<vmem>>, vector<16x128xf32>
    %1 = arith.truncf %0 : vector<16x128xf32> to vector<16x128xbf16>
    %c0_1 = arith.constant 0 : index
    %c0_2 = arith.constant 0 : index
    %2 = vector.load %arg3[%c0_1, %c0_2] : memref<128x640xbf16, #tpu.memory_space<vmem>>, vector<128x640xbf16>
    %cst = arith.constant dense<0.000000e+00> : vector<16x640xf32>
    %3 = tpu.matmul %1, %2, %cst {dimension_numbers = #tpu.dot_dimension_numbers<[1], [0], [0], [1], [0, 0, 1, 1], [], []>} : vector<16x128xbf16>, vector<128x640xbf16>, vector<16x640xf32> -> vector<16x640xf32>
    %c0_3 = arith.constant 0 : index
    %c0_4 = arith.constant 0 : index
    %4 = vector.load %arg1[%c0_3, %c0_4] : memref<16x128xf32, #tpu.memory_space<vmem>>, vector<16x128xf32>
    %5 = vector.extract_strided_slice %3 {offsets = [0, 0], sizes = [16, 128], strides = [1, 1]} : vector<16x640xf32> to vector<16x128xf32>
    %6 = arith.mulf %5, %4 : vector<16x128xf32>
    %cst_5 = arith.constant dense<0.000000e+00> : vector<16xf32>
    %7 = vector.multi_reduction <add>, %6, %cst_5 [1] : vector<16x128xf32> to vector<16xf32>
    %8 = vector.shape_cast %7 : vector<16xf32> to vector<16x1xf32>
    %9 = vector.extract_strided_slice %3 {offsets = [0, 128], sizes = [16, 128], strides = [1, 1]} : vector<16x640xf32> to vector<16x128xf32>
    %10 = arith.mulf %9, %4 : vector<16x128xf32>
    %cst_6 = arith.constant dense<0.000000e+00> : vector<16xf32>
    %11 = vector.multi_reduction <add>, %10, %cst_6 [1] : vector<16x128xf32> to vector<16xf32>
    %12 = vector.shape_cast %11 : vector<16xf32> to vector<16x1xf32>
    %13 = vector.extract_strided_slice %3 {offsets = [0, 256], sizes = [16, 128], strides = [1, 1]} : vector<16x640xf32> to vector<16x128xf32>
    %14 = arith.mulf %13, %4 : vector<16x128xf32>
    %cst_7 = arith.constant dense<0.000000e+00> : vector<16xf32>
    %15 = vector.multi_reduction <add>, %14, %cst_7 [1] : vector<16x128xf32> to vector<16xf32>
    %16 = vector.shape_cast %15 : vector<16xf32> to vector<16x1xf32>
    %17 = vector.extract_strided_slice %3 {offsets = [0, 384], sizes = [16, 128], strides = [1, 1]} : vector<16x640xf32> to vector<16x128xf32>
    %18 = arith.mulf %17, %4 : vector<16x128xf32>
    %cst_8 = arith.constant dense<0.000000e+00> : vector<16xf32>
    %19 = vector.multi_reduction <add>, %18, %cst_8 [1] : vector<16x128xf32> to vector<16xf32>
    %20 = vector.shape_cast %19 : vector<16xf32> to vector<16x1xf32>
    %21 = vector.extract_strided_slice %3 {offsets = [0, 512], sizes = [16, 128], strides = [1, 1]} : vector<16x640xf32> to vector<16x128xf32>
    %22 = arith.mulf %21, %4 : vector<16x128xf32>
    %cst_9 = arith.constant dense<0.000000e+00> : vector<16xf32>
    %23 = vector.multi_reduction <add>, %22, %cst_9 [1] : vector<16x128xf32> to vector<16xf32>
    %24 = vector.shape_cast %23 : vector<16xf32> to vector<16x1xf32>
    %25 = tpu.concatenate %8, %12, %16, %20, %24 in 1 : vector<16x1xf32>, vector<16x1xf32>, vector<16x1xf32>, vector<16x1xf32>, vector<16x1xf32> -> vector<16x5xf32>
    %c0_10 = arith.constant 0 : index
    %c0_11 = arith.constant 0 : index
    %26 = vector.load %arg4[%c0_10, %c0_11] : memref<16x5xf32, #tpu.memory_space<vmem>>, vector<16x5xf32>
    tpu.vector_store %arg4[%c0_10, %c0_11], %25 {strides = array<i32>} : memref<16x5xf32, #tpu.memory_space<vmem>>, vector<16x5xf32>,
    return
  }
  func.func @transform_0(%arg0: i32) -> (i32, i32) {
    %c0_i32 = arith.constant 0 : i32
    %c0_i32_0 = arith.constant 0 : i32
    return %arg0, %c0_i32 : i32, i32
  }
  func.func @transform_1(%arg0: i32) -> (i32, i32) {
    %c0_i32 = arith.constant 0 : i32
    %c0_i32_0 = arith.constant 0 : i32
    return %arg0, %c0_i32 : i32, i32
  }
  func.func @transform_2(%arg0: i32) -> (i32, i32) {
    %c0_i32 = arith.constant 0 : i32
    %c0_i32_0 = arith.constant 0 : i32
    %c0_i32_1 = arith.constant 0 : i32
    return %c0_i32, %c0_i32_0 : i32, i32
  }
  func.func @transform_3(%arg0: i32) -> (i32, i32) {
    %c0_i32 = arith.constant 0 : i32
    %c0_i32_0 = arith.constant 0 : i32
    return %arg0, %c0_i32 : i32, i32
  }
}

module attributes {stable_mosaic.version = 11 : i64} {
  func.func @_mix_bases_kernel(%arg0: i32, %arg1: memref<3x5xf32, #tpu.memory_space<smem>>, %arg2: memref<3x1x128x128xf32, #tpu.memory_space<vmem>>, %arg3: memref<128x128xbf16, #tpu.memory_space<vmem>>) attributes {dimension_semantics = [#tpu.dimension_semantics<parallel>], iteration_bounds = array<i64: 5>, scalar_prefetch = 1 : i64, scratch_operands = 0 : i64, tpu.core_type = #tpu.core_type<tc>, window_params = [{transform_indices = @transform_0, window_bounds = array<i64: 3, 1, 128, 128>}, {transform_indices = @transform_1, window_bounds = array<i64: 128, 128>}]} {
    %c0 = arith.constant 0 : index
    %0 = arith.index_cast %arg0 : i32 to index
    %1 = memref.load %arg1[%c0, %0] : memref<3x5xf32, #tpu.memory_space<smem>>
    %c0_0 = arith.constant 0 : index
    %c0_1 = arith.constant 0 : index
    %c0_2 = arith.constant 0 : index
    %c0_3 = arith.constant 0 : index
    %2 = vector.load %arg2[%c0_0, %c0_1, %c0_2, %c0_3] : memref<3x1x128x128xf32, #tpu.memory_space<vmem>>, vector<1x1x128x128xf32>
    %3 = vector.shape_cast %2 : vector<1x1x128x128xf32> to vector<128x128xf32>
    %4 = vector.broadcast %1 : f32 to vector<128x128xf32>
    %5 = arith.mulf %4, %3 : vector<128x128xf32>
    %c1 = arith.constant 1 : index
    %6 = arith.index_cast %arg0 : i32 to index
    %7 = memref.load %arg1[%c1, %6] : memref<3x5xf32, #tpu.memory_space<smem>>
    %c1_4 = arith.constant 1 : index
    %c0_5 = arith.constant 0 : index
    %c0_6 = arith.constant 0 : index
    %c0_7 = arith.constant 0 : index
    %8 = vector.load %arg2[%c1_4, %c0_5, %c0_6, %c0_7] : memref<3x1x128x128xf32, #tpu.memory_space<vmem>>, vector<1x1x128x128xf32>
    %9 = vector.shape_cast %8 : vector<1x1x128x128xf32> to vector<128x128xf32>
    %10 = vector.broadcast %7 : f32 to vector<128x128xf32>
    %11 = arith.mulf %10, %9 : vector<128x128xf32>
    %12 = arith.addf %5, %11 : vector<128x128xf32>
    %c2 = arith.constant 2 : index
    %13 = arith.index_cast %arg0 : i32 to index
    %14 = memref.load %arg1[%c2, %13] : memref<3x5xf32, #tpu.memory_space<smem>>
    %c2_8 = arith.constant 2 : index
    %c0_9 = arith.constant 0 : index
    %c0_10 = arith.constant 0 : index
    %c0_11 = arith.constant 0 : index
    %15 = vector.load %arg2[%c2_8, %c0_9, %c0_10, %c0_11] : memref<3x1x128x128xf32, #tpu.memory_space<vmem>>, vector<1x1x128x128xf32>
    %16 = vector.shape_cast %15 : vector<1x1x128x128xf32> to vector<128x128xf32>
    %17 = vector.broadcast %14 : f32 to vector<128x128xf32>
    %18 = arith.mulf %17, %16 : vector<128x128xf32>
    %19 = arith.addf %12, %18 : vector<128x128xf32>
    %20 = arith.truncf %19 : vector<128x128xf32> to vector<128x128xbf16>
    %c0_12 = arith.constant 0 : index
    %c0_13 = arith.constant 0 : index
    %21 = vector.load %arg3[%c0_12, %c0_13] : memref<128x128xbf16, #tpu.memory_space<vmem>>, vector<128x128xbf16>
    tpu.vector_store %arg3[%c0_12, %c0_13], %20 {strides = array<i32>} : memref<128x128xbf16, #tpu.memory_space<vmem>>, vector<128x128xbf16>,
    return
  }
  func.func @transform_0(%arg0: i32, %arg1: memref<3x5xf32, #tpu.memory_space<smem>>) -> (i32, i32, i32, i32) {
    %c0_i32 = arith.constant 0 : i32
    %c0_i32_0 = arith.constant 0 : i32
    %c0_i32_1 = arith.constant 0 : i32
    %c0_i32_2 = arith.constant 0 : i32
    return %c0_i32, %arg0, %c0_i32_0, %c0_i32_1 : i32, i32, i32, i32
  }
  func.func @transform_1(%arg0: i32, %arg1: memref<3x5xf32, #tpu.memory_space<smem>>) -> (i32, i32) {
    %c0_i32 = arith.constant 0 : i32
    %c0_i32_0 = arith.constant 0 : i32
    return %c0_i32, %arg0 : i32, i32
  }
}

</mosaic_0001>

<bundles_post_ra>
// kernel: rating_predictor_forward.2
= control target key start
LH: loop header
LB: loop body
LE: loop exit
PB: predicated region body
PF: predicated region fallthrough
CT: control target
= control target key end

     0   :  { %s1051_s0 = inlined_call_operand.vmem [shape: f32[3,5], index: 0, kind: input, shape index: {}]   ;;  %s1052_s1 = inlined_call_operand.hbm [shape: f32[3,5,128,128], index: 1, kind: input, shape index: {}]   ;;  %s1053_s2 = inlined_call_operand.vmem [shape: bf16[128,640], index: 2, kind: output, shape index: {}]  }
   0x1   :  { %s7_s11 = sshll.u32 %s1051_s0, 4  ;;  %s8_s11 = int_to_ptr.vmem [resolvable:$true] %s7_s11 }
   0x2   :  { %s740_s12 = scalar_lea.vmem %s8_s11, 64  ;;  %p745_p1 = scmp.lt.s32.totalorder %s8_s11, %s8_s11 }
   0x3   :  { %p741_p0 = scmp.ne.s32.totalorder %s8_s11, %s740_s12  ;;  %p746_p2 = scmp.lt.s32.totalorder %s740_s12, %s740_s12 }
   0x5   :  { %p747_p3 = por %p746_p2, %p745_p1 }
   0x7   :  { %p748_p4 = pnand %p747_p3, %p741_p0 }
   0x9   :  { %751 = shalt.err (!%p748_p4)  }
   0xa   :  { %s790_s13 = smov [#allocation3]  }
   0xb   :  { %10 = dma.vmem_to_smem %s8_s11, 64, %s790_s13, [#allocation2] }
   0xc   :  { %768 = dma.done.wait [#allocation2], 64 }
   0xd   :  { %769 = vsyncadd [#allocation2], 4294967232 }
   0xe   :  { %12 = sfence }
   0xf   :  { %13 = vsyncpa [#allocation5], 0 }
  0x10   :  { %15 = vsyncpa [#allocation5 + $0x1], 0  ;;  %s815_s14 = smov 0   ;;  %s817_s15 = smov 0  }
  0x11   :  { %s819_s0 = smov 0   ;;  %s821_s16 = smov 0  }
  0x12 LB: > { %s834_s17 = sadd.s32 4294967295, %s788_s16   ;;  %s837_s18 = sadd.s32 1, %s788_s16   ;;  %s788_s16 = sphi %s821_s16, %s1060_s16   ;;  %s784_s0 = sphi %s819_s0, %s1059_s0   ;;  %s780_s15 = sphi %s817_s15, %s1058_s15   ;;  %s776_s14 = sphi %s815_s14, %s1057_s14  }
  0x13   : > { %s25_s19 = ssub.s32 %s788_s16, %s837_s18  ;;  %s28_s20 = sadd.s32 1, %s784_s0 }
  0x14   : > { %p26_p5 = scmp.eq.s32.totalorder %s25_s19, 0  ;;  %p35_p6 = scmp.ne.s32.totalorder %s784_s0, %s780_s15 }
  0x15   : > { %p36_p7 = scmp.eq.s32.totalorder %s788_s16, 0  ;;  %p41_p8 = scmp.ne.s32.totalorder %s780_s15, %s776_s14 }
  0x16   : > { %s847_s21 = scalar_select %p26_p5, %s784_s0, %s28_s20  }
  0x17   : > { %p849_p9 = por %p36_p7, %p35_p6  ;;  %p42_p10 = scmp.eq.s32.totalorder %s834_s17, 0 }
  0x18   : > { %p65_p11 = scmp.eq.s32.totalorder %s834_s17, 4  ;;  %p561_p0 = scmp.ge.s32.totalorder %s788_s16, 5 }
  0x19   : > { %p855_p12 = por %p42_p10, %p41_p8 }
  0x1a   : > { %p859_p13 = por %p65_p11, %p35_p6  ;;  %87 = sbr.rel (%p561_p0) target bundleno = 47 (0x2f), region = 16 }
  0x21   : > { %s91_s25 = sand.u32 1, %s784_s0   ;;  %s622_s27 = sshll.u32 %s788_s16, 11 }
  0x22   : > { %s690_s26 = smul.u32 384, %s91_s25  ;;  %s791_s28 = smov 10240  }
  0x23   : > { %693 = sst [smem:[#allocation8]] (%p849_p9), %s791_s28  ;;  %s101_s4 = scalar_lea.hbm %s1052_s1, %s622_s27 }
  0x24   : > { %s692_s29 = scalar_select %p849_p9, [#allocation0], [#allocation9] }
  0x25   : > { %s95_s6 = scalar_lea.vmem [#allocation4], %s690_s26  ;;  %s792_s8 = smov 2048  }
  0x26   : > { %s106_s5 = sld [smem:[%s692_s29]]   ;;  %s114_s7 = sshll.u32 %s95_s6, 4  ;;  %s115_s7 = int_to_ptr.vmem [resolvable:$true] %s114_s7 }
  0x27   : > { %694 = sst [smem:[#allocation8 + $0x1]] (%p849_p9), %s792_s8  ;;  %s793_s9 = smov 16  }
  0x28   : > { %695 = sst [smem:[#allocation8 + $0x2]] (%p849_p9), %s793_s9  ;;  %s794_s10 = smov 128  }
  0x29   : > { %696 = sst [smem:[#allocation8 + $0x3]] (%p849_p9), %s794_s10  ;;  %s795_s11 = smov 8  }
  0x2a   : > { %697 = sst [smem:[#allocation8 + $0x4]] (%p849_p9), %s794_s10  ;;  %s92_s14 = scalar_lea.sflag [#allocation5], %s91_s25 }
  0x2b   : > { %698 = sst [smem:[#allocation8 + $0x5]] (%p849_p9), %s795_s11  ;;  %s796_s19 = smov [#allocation7]  }
  0x2c   : > { %s564_s12 = sshll.u32 %s106_s5, 26 }
  0x2d   : > { %s565_s13 = sadd.s32 134217728, %s564_s12 }
  0x2e   : > { %699 = dma.general (%p849_p9), %s101_s4, 6144, %s115_s7, %s92_s14, %s796_s19, [#allocation8], %s565_s13, 0  }
  0x2f PF: > { %p566_p1 = scmp.ge.s32.totalorder %s788_s16, 1  ;;  %p135_p2 = scmp.lt.s32.totalorder %s788_s16, 6 }
  0x31   : > { %p136_p3 = pnand %p566_p1, %p135_p2 }
  0x32   : > { %s888_s20 = sand.u32 (!%p136_p3), 1, %s780_s15  }
  0x33   : > { %139 = sbr.rel (%p136_p3) target bundleno = 104 (0x68), region = 24  ;;  %s142_s27 = scalar_lea.sflag (!%p136_p3), [#allocation5], %s888_s20 }
  0x34   : > { %s691_s26 = smul.u32 (!%p136_p3), 384, %s888_s20 }
  0x36   : > { %s892_s28 = scalar_lea.vmem (!%p136_p3), [#allocation4], %s691_s26 }
  0x3a   : > { %771 = dma.done.wait (%p855_p12), %s142_s27, 6144  }
  0x3b   : > { %773 = vsyncadd (%p855_p12), %s142_s27, 4294961152  ;;  %s197_s16 = sshra.s32 %s834_s17, 7  ;;  %s163_s22 = sld [smem:[#allocation3 + %s834_s17]]  ;;  %v164_v0 = vld [vmem:[%s892_s28] sm:$0xff]  ;;  %v165_v1 = vld [vmem:[%s892_s28 + $0x8] sm:$0xff] }
  0x3c   : > { %s623_s25 = sshll.u32 %s197_s16, 7  ;;  %s202_s29 = sand.u32 127, %s834_s17  ;;  %v569_v3 = vld [vmem:[%s892_s28 + $0x80] sm:$0xff]  ;;  %v570_v4 = vld [vmem:[%s892_s28 + $0x88] sm:$0xff]  ;;  %v166_v7 = vld [vmem:[%s892_s28 + $0x10] sm:$0xff] }
  0x3d   : > { %s624_s30 = sadd.s32 128, %s623_s25  ;;  %s626_s3 = sadd.s32 256, %s623_s25  ;;  %v586_v5 = vld [vmem:[%s892_s28 + $0x100] sm:$0xff]  ;;  %v587_v6 = vld [vmem:[%s892_s28 + $0x108] sm:$0xff]  ;;  %v167_v8 = vld [vmem:[%s892_s28 + $0x18] sm:$0xff] }
  0x3e   : > { %s203_s23 = sadd.s32 %s624_s30, %s202_s29  ;;  %s257_s4 = sadd.s32 %s626_s3, %s202_s29  ;;  %v571_v9 = vld [vmem:[%s892_s28 + $0x90] sm:$0xff]  ;;  %v572_v12 = vld [vmem:[%s892_s28 + $0x98] sm:$0xff]  ;;  %v168_v19 = vld [vmem:[%s892_s28 + $0x20] sm:$0xff] }
  0x3f   : > { %s204_s5 = sld [smem:[#allocation3 + %s203_s23]]  ;;  %v588_v13 = vld [vmem:[%s892_s28 + $0x110] sm:$0xff]  ;;  %v589_v14 = vld [vmem:[%s892_s28 + $0x118] sm:$0xff]  ;;  %v169_v20 = vld [vmem:[%s892_s28 + $0x28] sm:$0xff]  ;;  %s567_s7 = sshll.u32 %s888_s20, 6 }
  0x40   : > { %s258_s6 = sld [smem:[#allocation3 + %s257_s4]]  ;;  %v573_v25 = vld [vmem:[%s892_s28 + $0xa0] sm:$0xff]  ;;  %v574_v26 = vld [vmem:[%s892_s28 + $0xa8] sm:$0xff]  ;;  %v170_v41 = vld [vmem:[%s892_s28 + $0x30] sm:$0xff]  ;;  %s962_s8 = scalar_lea.vmem [#allocation6], %s567_s7 }
  0x41   : > { %v903_v2 = vstv %s163_s22  ;;  %v590_v31 = vld [vmem:[%s892_s28 + $0x120] sm:$0xff]  ;;  %v591_v32 = vld [vmem:[%s892_s28 + $0x128] sm:$0xff]  ;;  %v171_v42 = vld [vmem:[%s892_s28 + $0x38] sm:$0xff]  ;;  %s619_s9 = sshll.u32 (%p859_p13), %s834_s17, 2 }
  0x42   : > { %v181_v10 = vmul.f32 %v903_v2, %v164_v0  ;;  %v182_v11 = vmul.f32 %v903_v2, %v165_v1  ;;  %v183_v17 = vmul.f32 %v903_v2, %v166_v7  ;;  %v184_v18 = vmul.f32 %v903_v2, %v167_v8  ;;  %v575_v43 = vld [vmem:[%s892_s28 + $0xb0] sm:$0xff]  ;;  %v576_v48 = vld [vmem:[%s892_s28 + $0xb8] sm:$0xff]  ;;  %v172_v55 = vld [vmem:[%s892_s28 + $0x40] sm:$0xff]  ;;  %s397_s12 = scalar_lea.vmem (%p859_p13), %s1053_s2, %s619_s9 }
  0x43   : > { %v185_v35 = vmul.f32 %v903_v2, %v168_v19  ;;  %v186_v36 = vmul.f32 %v903_v2, %v169_v20  ;;  %v592_v53 = vld [vmem:[%s892_s28 + $0x130] sm:$0xff]  ;;  %v593_v54 = vld [vmem:[%s892_s28 + $0x138] sm:$0xff]  ;;  %v187_v57 = vmul.f32 %v903_v2, %v170_v41  ;;  %v188_v58 = vmul.f32 %v903_v2, %v171_v42  ;;  %v173_v60 = vld [vmem:[%s892_s28 + $0x48] sm:$0xff] }
  0x44   : > { %v577_v61 = vld [vmem:[%s892_s28 + $0xc0] sm:$0xff]  ;;  %v580_v19 = vld [vmem:[%s892_s28 + $0xd8] sm:$0xff]  ;;  %v596_v20 = vld [vmem:[%s892_s28 + $0x150] sm:$0xff] }
  0x45   : > { %v917_v15 = vstv %s204_s5 }
  0x46   : > { %v919_v16 = vstv %s258_s6  ;;  %v223_v21 = vmul.f32 %v569_v3, %v917_v15  ;;  %v224_v22 = vmul.f32 %v570_v4, %v917_v15  ;;  %v225_v27 = vmul.f32 %v571_v9, %v917_v15  ;;  %v578_v3 = vld [vmem:[%s892_s28 + $0xc8] sm:$0xff]  ;;  %v594_v4 = vld [vmem:[%s892_s28 + $0x140] sm:$0xff] }
  0x47   : > { %v277_v23 = vmul.f32 %v586_v5, %v919_v16  ;;  %v278_v24 = vmul.f32 %v587_v6, %v919_v16  ;;  %v226_v28 = vmul.f32 %v572_v12, %v917_v15  ;;  %v279_v29 = vmul.f32 %v588_v13, %v919_v16  ;;  %v595_v5 = vld [vmem:[%s892_s28 + $0x148] sm:$0xff] }
  0x48   : > { %v280_v30 = vmul.f32 %v589_v14, %v919_v16  ;;  %v239_v33 = vadd.f32 %v223_v21, %v181_v10  ;;  %v240_v34 = vadd.f32 %v224_v22, %v182_v11  ;;  %v241_v37 = vadd.f32 %v225_v27, %v183_v17  ;;  %v174_v10 = vld [vmem:[%s892_s28 + $0x50] sm:$0xff]  ;;  %v175_v11 = vld [vmem:[%s892_s28 + $0x58] sm:$0xff] }
  0x49   : > { %v242_v38 = vadd.f32 %v226_v28, %v184_v18  ;;  %v227_v39 = vmul.f32 %v573_v25, %v917_v15  ;;  %v228_v40 = vmul.f32 %v574_v26, %v917_v15  ;;  %v281_v46 = vmul.f32 %v590_v31, %v919_v16  ;;  %v579_v18 = vld [vmem:[%s892_s28 + $0xd0] sm:$0xff]  ;;  %v597_v25 = vld [vmem:[%s892_s28 + $0x158] sm:$0xff]  ;;  %v176_v26 = vld [vmem:[%s892_s28 + $0x60] sm:$0xff] }
  0x4a   : > { %v293_v44 = vadd.f32 %v277_v23, %v239_v33  ;;  %v294_v45 = vadd.f32 %v278_v24, %v240_v34  ;;  %v282_v47 = vmul.f32 %v591_v32, %v919_v16  ;;  %v295_v49 = vadd.f32 %v279_v29, %v241_v37  ;;  %v177_v31 = vld [vmem:[%s892_s28 + $0x68] sm:$0xff]  ;;  %v581_v32 = vld [vmem:[%s892_s28 + $0xe0] sm:$0xff] }
  0x4b   : > { %v296_v50 = vadd.f32 %v280_v30, %v242_v38  ;;  %v243_v51 = vadd.f32 %v227_v39, %v185_v35  ;;  %v244_v52 = vadd.f32 %v228_v40, %v186_v36  ;;  %v229_v59 = vmul.f32 %v575_v43, %v917_v15  ;;  %v582_v37 = vld [vmem:[%s892_s28 + $0xe8] sm:$0xff]  ;;  %v598_v38 = vld [vmem:[%s892_s28 + $0x160] sm:$0xff] }
  0x4c   : > { %v646_v56 = vpack.c.bf16 %v294_v45, %v293_v44  ;;  %v230_v1 = vmul.f32 %v576_v48, %v917_v15  ;;  %v283_v7 = vmul.f32 %v592_v53, %v919_v16  ;;  %v284_v8 = vmul.f32 %v593_v54, %v919_v16  ;;  %v599_v39 = vld [vmem:[%s892_s28 + $0x168] sm:$0xff]  ;;  %v178_v44 = vld [vmem:[%s892_s28 + $0x70] sm:$0xff] }
  0x4d   : > { %v651_v62 = vpack.c.bf16 %v296_v50, %v295_v49  ;;  %v297_v63 = vadd.f32 %v281_v46, %v243_v51  ;;  %v298_v0 = vadd.f32 %v282_v47, %v244_v52  ;;  %v245_v6 = vadd.f32 %v229_v59, %v187_v57  ;;  %v179_v49 = vld [vmem:[%s892_s28 + $0x78] sm:$0xff]  ;;  %v583_v50 = vld [vmem:[%s892_s28 + $0xf0] sm:$0xff] }
  0x4e   : > { %647 = vst [vmem:[%s962_s8] sm:$0xff] %v646_v56   ;;  %v189_v9 = vmul.f32 %v903_v2, %v172_v55  ;;  %v246_v13 = vadd.f32 %v230_v1, %v188_v58  ;;  %v190_v14 = vmul.f32 %v903_v2, %v173_v60  ;;  %v231_v17 = vmul.f32 %v577_v61, %v917_v15  ;;  %v584_v55 = vld [vmem:[%s892_s28 + $0xf8] sm:$0xff]  ;;  %v600_v56 = vld [vmem:[%s892_s28 + $0x170] sm:$0xff] }
  0x4f   : > { %683 = vst [vmem:[%s962_s8 + $0x8] sm:$0xff] %v651_v62   ;;  %v656_v12 = vpack.c.bf16 %v298_v0, %v297_v63  ;;  %v299_v21 = vadd.f32 %v283_v7, %v245_v6  ;;  %v232_v22 = vmul.f32 %v578_v3, %v917_v15  ;;  %v285_v23 = vmul.f32 %v594_v4, %v919_v16  ;;  %v601_v57 = vld [vmem:[%s892_s28 + $0x178] sm:$0xff] }
  0x50   : > { %v286_v24 = vmul.f32 %v595_v5, %v919_v16  ;;  %v300_v27 = vadd.f32 %v284_v8, %v246_v13  ;;  %v247_v28 = vadd.f32 %v231_v17, %v189_v9  ;;  %v191_v29 = vmul.f32 %v903_v2, %v174_v10 }
  0x51   : > { %684 = vst [vmem:[%s962_s8 + $0x10] sm:$0xff] %v656_v12   ;;  %v192_v30 = vmul.f32 %v903_v2, %v175_v11  ;;  %v248_v33 = vadd.f32 %v232_v22, %v190_v14  ;;  %v233_v34 = vmul.f32 %v579_v18, %v917_v15  ;;  %v234_v35 = vmul.f32 %v580_v19, %v917_v15 }
  0x52   : > { %v287_v36 = vmul.f32 %v596_v20, %v919_v16  ;;  %v661_v40 = vpack.c.bf16 %v300_v27, %v299_v21  ;;  %v301_v41 = vadd.f32 %v285_v23, %v247_v28  ;;  %v288_v42 = vmul.f32 %v597_v25, %v919_v16 }
  0x53   : > { %v193_v43 = vmul.f32 %v903_v2, %v176_v26  ;;  %v302_v45 = vadd.f32 %v286_v24, %v248_v33  ;;  %v249_v46 = vadd.f32 %v233_v34, %v191_v29  ;;  %v250_v47 = vadd.f32 %v234_v35, %v192_v30 }
  0x54   : > { %v194_v48 = vmul.f32 %v903_v2, %v177_v31  ;;  %685 = vst [vmem:[%s962_s8 + $0x18] sm:$0xff] %v661_v40   ;;  %v235_v51 = vmul.f32 %v581_v32, %v917_v15  ;;  %v236_v52 = vmul.f32 %v582_v37, %v917_v15  ;;  %v289_v53 = vmul.f32 %v598_v38, %v919_v16 }
  0x55   : > { %v290_v54 = vmul.f32 %v599_v39, %v919_v16  ;;  %v666_v58 = vpack.c.bf16 %v302_v45, %v301_v41  ;;  %v303_v59 = vadd.f32 %v287_v36, %v249_v46  ;;  %v304_v60 = vadd.f32 %v288_v42, %v250_v47 }
  0x56   : > { %v195_v61 = vmul.f32 %v903_v2, %v178_v44  ;;  %v251_v62 = vadd.f32 %v235_v51, %v193_v43  ;;  %v252_v63 = vadd.f32 %v236_v52, %v194_v48  ;;  %v196_v0 = vmul.f32 %v903_v2, %v179_v49  ;;  %v417_v14 = vld [vmem:[%s962_s8 + $0x8] sm:$0xf] (%p859_p13)  ;;  %v419_v17 = vld [vmem:[%s962_s8 + $0xc] sm:$0xf] (%p859_p13) }
  0x57   : > { %v237_v1 = vmul.f32 %v583_v50, %v917_v15  ;;  %686 = vst [vmem:[%s962_s8 + $0x20] sm:$0xff] %v666_v58   ;;  %v671_v3 = vpack.c.bf16 %v304_v60, %v303_v59  ;;  %v238_v4 = vmul.f32 %v584_v55, %v917_v15  ;;  %v291_v5 = vmul.f32 %v600_v56, %v919_v16  ;;  %v413_v15 = vld [vmem:[%s962_s8] sm:$0xf] (%p859_p13) }
  0x58   : > { %v292_v6 = vmul.f32 %v601_v57, %v919_v16  ;;  %v305_v7 = vadd.f32 %v289_v53, %v251_v62  ;;  %v306_v8 = vadd.f32 %v290_v54, %v252_v63  ;;  %v415_v16 = vld [vmem:[%s962_s8 + $0x4] sm:$0xf] (%p859_p13)  ;;  %v421_v18 = vld [vmem:[%s962_s8 + $0x10] sm:$0xf] (%p859_p13)  ;;  %414 = vst [vmem:[%s397_s12] sm:$0xf] (%p859_p13), %v413_v15 }
  0x59   : > { %v253_v9 = vadd.f32 %v237_v1, %v195_v61  ;;  %687 = vst [vmem:[%s962_s8 + $0x28] sm:$0xff] %v671_v3   ;;  %v254_v10 = vadd.f32 %v238_v4, %v196_v0  ;;  %395 = sbr.rel (!%p859_p13) target bundleno = 104 (0x68), region = 32  ;;  %416 = vst [vmem:[%s397_s12 + $0x14] sm:$0xf] (%p859_p13), %v415_v16  ;;  %v423_v19 = vld [vmem:[%s962_s8 + $0x14] sm:$0xf] (%p859_p13) }
  0x5a   : > { %v676_v11 = vpack.c.bf16 %v306_v8, %v305_v7  ;;  %418 = vst [vmem:[%s397_s12 + $0x28] sm:$0xf] (%p859_p13), %v417_v14  ;;  %420 = vst [vmem:[%s397_s12 + $0x3c] sm:$0xf] (%p859_p13), %v419_v17 }
  0x5b   : > { %v307_v12 = vadd.f32 %v291_v5, %v253_v9  ;;  %v308_v13 = vadd.f32 %v292_v6, %v254_v10  ;;  %422 = vst [vmem:[%s397_s12 + $0x50] sm:$0xf] (%p859_p13), %v421_v18  ;;  %v425_v20 = vld [vmem:[%s962_s8 + $0x18] sm:$0xf] (%p859_p13)  ;;  %v427_v21 = vld [vmem:[%s962_s8 + $0x1c] sm:$0xf] (%p859_p13) }
  0x5c   : > { %688 = vst [vmem:[%s962_s8 + $0x30] sm:$0xff] %v676_v11   ;;  %424 = vst [vmem:[%s397_s12 + $0x64] sm:$0xf] (%p859_p13), %v423_v19 }
  0x5d   : > { %v681_v2 = vpack.c.bf16 %v308_v13, %v307_v12  ;;  %426 = vst [vmem:[%s397_s12 + $0x78] sm:$0xf] (%p859_p13), %v425_v20  ;;  %428 = vst [vmem:[%s397_s12 + $0x8c] sm:$0xf] (%p859_p13), %v427_v21 }
  0x5e   : > { %v429_v22 = vld [vmem:[%s962_s8 + $0x20] sm:$0xf] (%p859_p13)  ;;  %v431_v23 = vld [vmem:[%s962_s8 + $0x24] sm:$0xf] (%p859_p13) }
  0x5f   : > { %689 = vst [vmem:[%s962_s8 + $0x38] sm:$0xff] %v681_v2   ;;  %430 = vst [vmem:[%s397_s12 + $0xa0] sm:$0xf] (%p859_p13), %v429_v22 }
  0x60   : > { %v433_v24 = vld [vmem:[%s962_s8 + $0x28] sm:$0xf]  ;;  %432 = vst [vmem:[%s397_s12 + $0xb4] sm:$0xf] %v431_v23  ;;  %v435_v25 = vld [vmem:[%s962_s8 + $0x2c] sm:$0xf] }
  0x61   : > { %434 = vst [vmem:[%s397_s12 + $0xc8] sm:$0xf] %v433_v24  ;;  %436 = vst [vmem:[%s397_s12 + $0xdc] sm:$0xf] %v435_v25 }
  0x63   : > { %v437_v26 = vld [vmem:[%s962_s8 + $0x30] sm:$0xf]  ;;  %v439_v27 = vld [vmem:[%s962_s8 + $0x34] sm:$0xf] }
  0x64   : > { %438 = vst [vmem:[%s397_s12 + $0xf0] sm:$0xf] %v437_v26  ;;  %440 = vst [vmem:[%s397_s12 + $0x104] sm:$0xf] %v439_v27 }
  0x66   : > { %v441_v28 = vld [vmem:[%s962_s8 + $0x38] sm:$0xf]  ;;  %v443_v29 = vld [vmem:[%s962_s8 + $0x3c] sm:$0xf] }
  0x67   : > { %442 = vst [vmem:[%s397_s12 + $0x118] sm:$0xf] %v441_v28  ;;  %444 = vst [vmem:[%s397_s12 + $0x12c] sm:$0xf] %v443_v29 }
  0x68 PF: > { %p18_p4 = scmp.ge.s32.totalorder %s837_s18, 7   ;;  %s1057_s14 = smov %s780_s15 }
  0x69   : > { %s1058_s15 = smov %s784_s0  ;;  %s1059_s0 = smov %s847_s21 }
  0x6a   : > { %s1060_s16 = smov %s837_s18  ;;  %20 = sbr.rel (!%p18_p4) target bundleno = 18 (0x12), region = 112 }
  0x71   :  { %509 = vsyncpa [#allocation5], 1 }
  0x72   :  { %511 = vsyncpa [#allocation5 + $0x1], 1 }

// kernel: rating_predictor_forward.3
= control target key start
LH: loop header
LB: loop body
LE: loop exit
PB: predicated region body
PF: predicated region fallthrough
CT: control target
= control target key end

     0   :  { %v580_v1 = vmov 0   ;;  %v581_v37 = vmov 0.0   ;;  %vm582_vm0 = vmmov 0   ;;  %vm433_vm1 = vcmask 7168   ;;  %s741_s2 = inlined_call_operand.vmem [shape: bf16[128,640], index: 2, kind: input, shape index: {}]   ;;  %s742_s1 = inlined_call_operand.vmem [shape: f32[16,128], index: 1, kind: input, shape index: {}]   ;;  %s743_s0 = inlined_call_operand.vmem [shape: f32[16,128], index: 0, kind: input, shape index: {}]   ;;  %s744_s3 = inlined_call_operand.vmem [shape: f32[16,5], index: 3, kind: output, shape index: {}]  }
   0x1   :  { %v524_v0 = vld [vmem:[%s741_s2 + $0x4] ss:$20 sps:$4 sm:$0xff]   ;;  %306 = vmatprep.mubr.bf16.mxu0 %v580_v1  ;;  %349 = vmatprep.mubr.bf16.mxu1 %v580_v1  ;;  %v526_v2 = vld [vmem:[%s741_s2] ss:$20 sps:$4 sm:$0xff]   ;;  %v531_v5 = vld [vmem:[%s741_s2 + $0x8] ss:$20 sps:$4 sm:$0xff]  }
   0x2   :  { %274 = vmatprep.subr.bf16.mxu0 %v524_v0  ;;  %v527_v3 = vld [vmem:[%s741_s2 + $0xc] ss:$20 sps:$4 sm:$0xff]   ;;  %v532_v6 = vld [vmem:[%s741_s2 + $0x28] ss:$20 sps:$4 sm:$0xff]   ;;  %v537_v9 = vld [vmem:[%s741_s2 + $0x30] ss:$20 sps:$4 sm:$0xff]  }
   0x3   :  { %275 = vmatpush1.bf16.msra.mxu0 %v526_v2  ;;  %v529_v4 = vld [vmem:[%s741_s2 + $0x2c] ss:$20 sps:$4 sm:$0xff]   ;;  %317 = vmatprep.subr.bf16.mxu1 %v527_v3  ;;  %v533_v7 = vld [vmem:[%s741_s2 + $0x34] ss:$20 sps:$4 sm:$0xff]   ;;  %v538_v10 = vld [vmem:[%s741_s2 + $0x50] ss:$20 sps:$4 sm:$0xff]  }
   0x4   :  { %276 = vmatprep.subr.bf16.mxu0 %v529_v4  ;;  %318 = vmatpush1.bf16.msra.mxu1 %v531_v5  ;;  %v535_v8 = vld [vmem:[%s741_s2 + $0x54] ss:$20 sps:$4 sm:$0xff]   ;;  %v539_v11 = vld [vmem:[%s741_s2 + $0x5c] ss:$20 sps:$4 sm:$0xff]   ;;  %v543_v13 = vld [vmem:[%s741_s2 + $0x58] ss:$20 sps:$4 sm:$0xff]  }
   0x5   :  { %319 = vmatprep.subr.bf16.mxu1 %v533_v7  ;;  %v541_v12 = vld [vmem:[%s741_s2 + $0x7c] ss:$20 sps:$4 sm:$0xff]   ;;  %v545_v14 = vld [vmem:[%s741_s2 + $0x84] ss:$20 sps:$4 sm:$0xff]   ;;  %v549_v17 = vld [vmem:[%s741_s2 + $0x80] ss:$20 sps:$4 sm:$0xff]  }
   0x6   :  { %v544_v15 = vld [vmem:[%s741_s2 + $0x78] ss:$20 sps:$4 sm:$0xff]   ;;  %v550_v19 = vld [vmem:[%s741_s2 + $0xa0] ss:$20 sps:$4 sm:$0xff]   ;;  %v555_v21 = vld [vmem:[%s741_s2 + $0xa8] ss:$20 sps:$4 sm:$0xff]  }
   0x7   :  { %277 = vmatpush1.bf16.msra.mxu0 %v532_v6  ;;  %v547_v16 = vld [vmem:[%s741_s2 + $0xa4] ss:$20 sps:$4 sm:$0xff]   ;;  %v551_v18 = vld [vmem:[%s741_s2 + $0xac] ss:$20 sps:$4 sm:$0xff]   ;;  %v557_v22 = vld [vmem:[%s741_s2 + $0xd4] ss:$20 sps:$4 sm:$0xff]  }
   0x8   :  { %278 = vmatprep.subr.bf16.mxu0 %v535_v8  ;;  %320 = vmatpush1.bf16.msra.mxu1 %v537_v9  ;;  %v553_v20 = vld [vmem:[%s741_s2 + $0xcc] ss:$20 sps:$4 sm:$0xff]   ;;  %v556_v23 = vld [vmem:[%s741_s2 + $0xc8] ss:$20 sps:$4 sm:$0xff]   ;;  %v561_v25 = vld [vmem:[%s741_s2 + $0xd0] ss:$20 sps:$4 sm:$0xff]  }
   0x9   :  { %321 = vmatprep.subr.bf16.mxu1 %v539_v11  ;;  %v559_v24 = vld [vmem:[%s741_s2 + $0xf4] ss:$20 sps:$4 sm:$0xff]   ;;  %v562_v26 = vld [vmem:[%s741_s2 + $0xf0] ss:$20 sps:$4 sm:$0xff]   ;;  %v567_v29 = vld [vmem:[%s741_s2 + $0xf8] ss:$20 sps:$4 sm:$0xff]  }
   0xa   :  { %v563_v27 = vld [vmem:[%s741_s2 + $0xfc] ss:$20 sps:$4 sm:$0xff]   ;;  %v568_v30 = vld [vmem:[%s741_s2 + $0x118] ss:$20 sps:$4 sm:$0xff]   ;;  %v15_v32 = vld [vmem:[%s742_s1] sm:$0xff]  ;;  %vm436_vm2 = vcmask 15360  }
   0xb   :  { %279 = vmatpush1.bf16.msra.mxu0 %v538_v10  ;;  %v565_v28 = vld [vmem:[%s741_s2 + $0x11c] ss:$20 sps:$4 sm:$0xff]   ;;  %v569_v31 = vld [vmem:[%s741_s2 + $0x124] ss:$20 sps:$4 sm:$0xff]   ;;  %v16_v33 = vld [vmem:[%s742_s1 + $0x8] sm:$0xff]  ;;  %vm439_vm3 = vcmask 23552  }
   0xc   :  { %280 = vmatprep.subr.bf16.mxu0 %v541_v12  ;;  %322 = vmatpush1.bf16.msra.mxu1 %v543_v13  ;;  %v571_v34 = vld [vmem:[%s741_s2 + $0x120] ss:$20 sps:$4 sm:$0xff]   ;;  %v17_v35 = vpack.c.bf16 %v16_v33, %v15_v32  ;;  %v572_v36 = vld [vmem:[%s741_s2 + $0x10] ss:$20 sps:$4 sm:$0xff]   ;;  %v573_v38 = vld [vmem:[%s741_s2 + $0x38] ss:$20 sps:$4 sm:$0xff]  }
   0xd   :  { %323 = vmatprep.subr.bf16.mxu1 %v545_v14  ;;  %v574_v39 = vld [vmem:[%s741_s2 + $0x60] ss:$20 sps:$4 sm:$0xff]   ;;  %v575_v40 = vld [vmem:[%s741_s2 + $0x88] ss:$20 sps:$4 sm:$0xff]   ;;  %v576_v41 = vld [vmem:[%s741_s2 + $0xb0] ss:$20 sps:$4 sm:$0xff]  }
   0xe   :  { %v577_v42 = vld [vmem:[%s741_s2 + $0xd8] ss:$20 sps:$4 sm:$0xff]   ;;  %v578_v43 = vld [vmem:[%s741_s2 + $0x100] ss:$20 sps:$4 sm:$0xff]   ;;  %v579_v44 = vld [vmem:[%s741_s2 + $0x128] ss:$20 sps:$4 sm:$0xff]  }
   0xf   :  { %281 = vmatpush1.bf16.msra.mxu0 %v544_v15  ;;  %v401_v45 = vld [vmem:[%s743_s0] sm:$0xff]  ;;  %v402_v55 = vld [vmem:[%s743_s0 + $0x8] sm:$0xff]  ;;  %vm442_vm4 = vcmask 31744   ;;  %vm445_vm5 = vcmask 39936  }
  0x10   :  { %282 = vmatprep.subr.bf16.mxu0 %v547_v16  ;;  %324 = vmatpush1.bf16.msra.mxu1 %v549_v17 }
  0x11   :  { %325 = vmatprep.subr.bf16.mxu1 %v551_v18 }
  0x13   :  { %283 = vmatpush1.bf16.msra.mxu0 %v550_v19 }
  0x14   :  { %284 = vmatprep.subr.bf16.mxu0 %v553_v20  ;;  %326 = vmatpush1.bf16.msra.mxu1 %v555_v21 }
  0x15   :  { %327 = vmatprep.subr.bf16.mxu1 %v557_v22 }
  0x17   :  { %285 = vmatpush1.bf16.msra.mxu0 %v556_v23 }
  0x18   :  { %286 = vmatprep.subr.bf16.mxu0 %v559_v24  ;;  %328 = vmatpush1.bf16.msra.mxu1 %v561_v25 }
  0x19   :  { %329 = vmatprep.subr.bf16.mxu1 %v563_v27 }
  0x1b   :  { %287 = vmatpush1.bf16.msra.mxu0 %v562_v26 }
  0x1c   :  { %288 = vmatprep.subr.bf16.mxu0 %v565_v28  ;;  %330 = vmatpush1.bf16.msra.mxu1 %v567_v29 }
  0x1d   :  { %331 = vmatprep.subr.bf16.mxu1 %v569_v31 }
  0x1f   :  { %289 = vmatpush1.bf16.msra.mxu0 %v568_v30 }
  0x20   :  { %501 = vmatprep.subr.bf16.mxu0 %v581_v37  ;;  %332 = vmatpush1.bf16.msra.mxu1 %v571_v34 }
  0x22   :  { %307 = vmatmul.mubr.bf16.vlgmr.msra.gmra.mrb[0].mxu0 %v17_v35 }
  0x23   :  { %502 = vmatpush3.bf16.msra.mxu0 %v572_v36  ;;  %517 = vmatprep.mubr.msk.bf16.mxu0 %vm582_vm0, %v581_v37 }
  0x24   :  { %350 = vmatmul.mubr.bf16.vlgmr.msra.gmra.mrb[0].mxu1 %v17_v35  ;;  %503 = vmatprep.subr.bf16.mxu0 %v581_v37 }
  0x27   :  { %504 = vmatpush3.bf16.msra.mxu0 %v573_v38 }
  0x28   :  { %505 = vmatprep.subr.bf16.mxu0 %v581_v37 }
  0x2b   :  { %506 = vmatpush3.bf16.msra.mxu0 %v574_v39 }
  0x2c   :  { %507 = vmatprep.subr.bf16.mxu0 %v581_v37 }
  0x2f   :  { %508 = vmatpush3.bf16.msra.mxu0 %v575_v40 }
  0x30   :  { %509 = vmatprep.subr.bf16.mxu0 %v581_v37 }
  0x33   :  { %510 = vmatpush3.bf16.msra.mxu0 %v576_v41 }
  0x34   :  { %511 = vmatprep.subr.bf16.mxu0 %v581_v37 }
  0x37   :  { %512 = vmatpush3.bf16.msra.mxu0 %v577_v42 }
  0x38   :  { %513 = vmatprep.subr.bf16.mxu0 %v581_v37 }
  0x3b   :  { %514 = vmatpush3.bf16.msra.mxu0 %v578_v43 }
  0x3c   :  { %515 = vmatprep.subr.bf16.mxu0 %v581_v37 }
  0x3f   :  { %516 = vmatpush3.bf16.msra.mxu0 %v579_v44 }
  0x42   :  { %518 = vmatmul.mubr.bf16.vlgmr.msra.gmra.mrb[4].mxu0 %v17_v35 }
  0xf5   :  { %v308_v46 = vpop.f32.mrb[0].mxu0 }
  0xf6   :  { %v310_v47 = vpop.f32.mrb[1].mxu0  ;;  %v403_v48 = vmul.f32 %v401_v45, %v308_v46 }
  0xf7   :  { %v312_v49 = vpop.f32.mrb[2].mxu0  ;;  %v351_v50 = vpop.f32.mrb[0].mxu1  ;;  %v409_v51 = vmul.f32 %v401_v45, %v310_v47 }
  0xf8   :  { %v314_v52 = vpop.f32.mrb[3].mxu0  ;;  %v415_v53 = vmul.f32 %v401_v45, %v351_v50  ;;  %405 = vadd.xlane.f32.xlu0 %v403_v48  ;;  %v353_v54 = vpop.f32.mrb[1].mxu1  ;;  %v404_v62 = vmul.f32 %v402_v55, %v312_v49 }
  0xf9   :  { %411 = vadd.xlane.f32.xlu1 %v409_v51  ;;  %v355_v56 = vpop.f32.mrb[2].mxu1  ;;  %v421_v59 = vmul.f32 %v401_v45, %v353_v54  ;;  %v410_v60 = vmul.f32 %v402_v55, %v314_v52 }
  0xfa   :  { %v416_v57 = vmul.f32 %v402_v55, %v355_v56  ;;  %v357_v58 = vpop.f32.mrb[3].mxu1 }
  0xfb   :  { %v422_v61 = vmul.f32 %v402_v55, %v357_v58 }
  0xfc   :  { %417 = vadd.xlane.f32.xlu0 %v415_v53 }
  0xfd   :  { %419 = vadd.xlane.f32.xlu1 %v416_v57 }
 0x100   :  { %423 = vadd.xlane.f32.xlu0 %v421_v59 }
 0x101   :  { %413 = vadd.xlane.f32.xlu1 %v410_v60 }
 0x104   :  { %407 = vadd.xlane.f32.xlu0 %v404_v62 }
 0x105   :  { %425 = vadd.xlane.f32.xlu1 %v422_v61 }
 0x115   :  { %v394_v63 = vpop.f32.mrb[4].mxu0 }
 0x116   :  { %v427_v0 = vmul.f32 %v401_v45, %v394_v63  ;;  %v519_v1 = vpop.f32.mrb[5].mxu0 }
 0x117   :  { %v397_v2 = vpop.f32.mrb[6].mxu0 }
 0x118   :  { %v428_v3 = vmul.f32 %v402_v55, %v397_v2  ;;  %v520_v4 = vpop.f32.mrb[7].mxu0  ;;  %429 = vadd.xlane.f32.xlu0 %v427_v0 }
 0x11a   :  { %431 = vadd.xlane.f32.xlu1 %v428_v3 }
 0x185   :  { %v406_v5 = vpop.xlane.xlu0 %405 }
 0x186   :  { %v412_v6 = vpop.xlane.xlu1 %411 }
 0x187   :  { %v434_v13 = vsel %vm433_vm1, %v406_v5, %v412_v6 }
 0x189   :  { %v418_v7 = vpop.xlane.xlu0 %417 }
 0x18a   :  { %v420_v8 = vpop.xlane.xlu1 %419  ;;  %v437_v15 = vsel %vm436_vm2, %v434_v13, %v418_v7 }
 0x18d   :  { %v424_v9 = vpop.xlane.xlu0 %423 }
 0x18e   :  { %v414_v10 = vpop.xlane.xlu1 %413  ;;  %v440_v17 = vsel %vm439_vm3, %v437_v15, %v424_v9 }
 0x191   :  { %v408_v11 = vpop.xlane.xlu0 %407 }
 0x192   :  { %v435_v12 = vsel %vm433_vm1, %v408_v11, %v414_v10  ;;  %v426_v14 = vpop.xlane.xlu1 %425 }
 0x193   :  { %v438_v16 = vsel %vm436_vm2, %v435_v12, %v420_v8 }
 0x194   :  { %v441_v20 = vsel %vm439_vm3, %v438_v16, %v426_v14 }
 0x1a5   :  { %v430_v18 = vpop.xlane.xlu0 %429 }
 0x1a6   :  { %v443_v19 = vsel %vm442_vm4, %v440_v17, %v430_v18 }
 0x1a7   :  { %446 = vst.msk [vmem:[%s744_s3] sm:$0xff] %vm445_vm5, %v443_v19  ;;  %v432_v21 = vpop.xlane.xlu1 %431 }
 0x1a8   :  { %v444_v22 = vsel %vm442_vm4, %v441_v20, %v432_v21 }
 0x1a9   :  { %447 = vst.msk [vmem:[%s744_s3 + $0x8] sm:$0xff] %vm445_vm5, %v444_v22 }

</bundles_post_ra>
